<compile_context>
chip_gen: v7x
topology: tpu7x:2x2x1
jax: 0.10.0
libtpu: 0.0.40
codegen_flags: <defaults>
</compile_context>

<pallas_src>
import jax
import jax.numpy as jnp
from jax.experimental import pallas as pl
from jax.experimental.pallas import tpu as pltpu

_TARGET_BLOCK_BYTES = 4 * 1024 * 1024    # ~4 MiB f32 body tile
_VMEM_LIMIT_BYTES = 48 * 1024 * 1024     # below v7x's 64 MiB physical VMEM/TC


def _sobel_core(xb, up, down):
    """|sobel_x| + |sobel_y| given each row's neighbour above / below.

    xb, up, down: (TH, W) float32. `up` / `down` already contain the zero
    padding (or the neighbouring tile's row) at the tile's top / bottom edge.
    """
    TH, W = xb.shape
    v = up + 2.0 * xb + down     # vertical smooth: sobel_x = V[:, j+1] - V[:, j-1]
    d = up - down                # vertical diff:   sobel_y = D[:, j-1] + 2D + D[:, j+1]

    col = jax.lax.broadcasted_iota(jnp.int32, (TH, W), 1)
    left_edge = col == 0                 # hoisted; reused for both V and D
    right_edge = col == W - 1

    v_l = jnp.where(left_edge, 0.0, pltpu.roll(v, shift=1, axis=1))       # V[:, j-1]
    v_r = jnp.where(right_edge, 0.0, pltpu.roll(v, shift=W - 1, axis=1))  # V[:, j+1]
    d_l = jnp.where(left_edge, 0.0, pltpu.roll(d, shift=1, axis=1))
    d_r = jnp.where(right_edge, 0.0, pltpu.roll(d, shift=W - 1, axis=1))

    return jnp.abs(v_r - v_l) + jnp.abs(d_l + 2.0 * d + d_r)


def _sobelxy_full_kernel(x_ref, o_ref):
    # x_ref / o_ref: (1, 1, H, W) -- full image per grid step; grid over N only.
    H, W = x_ref.shape[2], x_ref.shape[3]
    xb = x_ref[0, 0].astype(jnp.float32)
    row = jax.lax.broadcasted_iota(jnp.int32, (H, W), 0)
    up = jnp.where(row == 0, 0.0, pltpu.roll(xb, shift=1, axis=0))          # x[i-1, :]
    down = jnp.where(row == H - 1, 0.0, pltpu.roll(xb, shift=H - 1, axis=0))  # x[i+1, :]
    o_ref[0, 0] = _sobel_core(xb, up, down).astype(o_ref.dtype)


def _sobelxy_halo_kernel(x_ref, top_ref, bot_ref, o_ref):
    # x_ref / o_ref : (1, 1, TH, W)  rows [h*TH, h*TH + TH)
    # top_ref       : (1, 1, 8,  W)  8-row block ending at row h*TH - 1 (clamped)
    # bot_ref       : (1, 1, 8,  W)  8-row block starting at row h*TH + TH (clamped)
    TH, W = x_ref.shape[2], x_ref.shape[3]
    h = pl.program_id(1)
    nh = pl.num_programs(1)

    xb = x_ref[0, 0].astype(jnp.float32)
    top_row = top_ref[0, 0].astype(jnp.float32)[7:8, :]   # row h*TH - 1 (junk at h == 0)
    bot_row = bot_ref[0, 0].astype(jnp.float32)[0:1, :]   # row h*TH + TH (junk at h == nh-1)
    # Virtual zero padding above / below the image (padding=1 in F.conv2d).
    top_row = jnp.where(h == 0, 0.0, top_row)
    bot_row = jnp.where(h == nh - 1, 0.0, bot_row)

    row = jax.lax.broadcasted_iota(jnp.int32, (TH, W), 0)
    up = jnp.where(row == 0, top_row, pltpu.roll(xb, shift=1, axis=0))
    down = jnp.where(row == TH - 1, bot_row, pltpu.roll(xb, shift=TH - 1, axis=0))
    o_ref[0, 0] = _sobel_core(xb, up, down).astype(o_ref.dtype)


def _pick_tile_h(H, W, target_bytes=_TARGET_BLOCK_BYTES):
    """Largest TH that divides H, is a multiple of 8, and keeps an f32 (TH, W)
    block under ~target_bytes; H itself if the whole image fits; else None."""
    max_rows = max(8, target_bytes // max(4 * W, 1))
    if H <= max_rows:
        return H
    best = None
    th = 8
    while th <= min(H, max_rows):
        if H % th == 0:
            best = th
        th += 8
    return best


def sobelxy(x, *, tile_h=None):
    """x: (N, 1, H, W) -> (N, 1, H, W), |sobel_x(x)| + |sobel_y(x)| (padding=1)."""
    N, C, H, W = x.shape
    assert C == 1, "Sobelxy weights are (1,1,3,3): input must have 1 channel"
    out_dtype = x.dtype if jnp.issubdtype(x.dtype, jnp.floating) else jnp.float32
    in_bytes = jnp.dtype(x.dtype).itemsize
    out_bytes = jnp.dtype(out_dtype).itemsize

    if tile_h is not None:
        TH = tile_h
    else:
        TH = _pick_tile_h(H, W)
        if TH is None:
            # TODO(synk): no multiple-of-8 divisor of H fits the VMEM target
            # (odd shapes); fall back to one full-height block per image.
            TH = H
        elif N == 1 and TH == H and H >= 16 and H % 16 == 0:
            # >= 2 parallel grid steps so both v7x TensorCores participate.
            TH = H // 2

    flops = 17 * N * H * W
    cparams = dict(vmem_limit_bytes=_VMEM_LIMIT_BYTES)

    if TH == H:
        # --- Common path: no halo operands, one input stream, grid over N. ---
        body_map = lambda n: (n, 0, 0, 0)
        return pl.pallas_call(
            _sobelxy_full_kernel,
            out_shape=jax.ShapeDtypeStruct((N, 1, H, W), out_dtype),
            grid_spec=pltpu.PrefetchScalarGridSpec(
                num_scalar_prefetch=0,
                grid=(N,),
                in_specs=[pl.BlockSpec((1, 1, H, W), body_map)],
                out_specs=pl.BlockSpec((1, 1, H, W), body_map),
            ),
            compiler_params=pltpu.CompilerParams(
                dimension_semantics=("parallel",), **cparams),
            cost_estimate=pl.CostEstimate(
                flops=flops, transcendentals=0,
                bytes_accessed=N * H * W * (in_bytes + out_bytes)),
        )(x)

    # --- Fallback: H-tiled with 8-row-aligned halo blocks. ---
    assert H % TH == 0 and TH % 8 == 0, (H, TH)
    nh = H // TH
    hb = TH // 8                      # body tile height in 8-row halo blocks
    nhb = H // 8                      # number of 8-row blocks along H

    body_map = lambda n, h: (n, 0, h, 0)
    top_map = lambda n, h: (n, 0, jnp.maximum(h * hb - 1, 0), 0)
    bot_map = lambda n, h: (n, 0, jnp.minimum((h + 1) * hb, nhb - 1), 0)

    bytes_accessed = (N * H * W * (in_bytes + out_bytes)
                      + N * nh * 2 * 8 * W * in_bytes)
    return pl.pallas_call(
        _sobelxy_halo_kernel,
        out_shape=jax.ShapeDtypeStruct((N, 1, H, W), out_dtype),
        grid_spec=pltpu.PrefetchScalarGridSpec(
            num_scalar_prefetch=0,
            grid=(N, nh),
            in_specs=[
                pl.BlockSpec((1, 1, TH, W), body_map),
                pl.BlockSpec((1, 1, 8, W), top_map),
                pl.BlockSpec((1, 1, 8, W), bot_map),
            ],
            out_specs=pl.BlockSpec((1, 1, TH, W), body_map),
        ),
        compiler_params=pltpu.CompilerParams(
            dimension_semantics=("parallel", "parallel"), **cparams),
        cost_estimate=pl.CostEstimate(
            flops=flops, transcendentals=0, bytes_accessed=bytes_accessed),
    )(x, x, x)


def _sobelxy_ref(x):
    """Pure-JAX reference (mirrors F.conv2d with padding=1)."""
    x = x.astype(jnp.float32)
    kx = jnp.array([[-1., 0., 1.], [-2., 0., 2.], [-1., 0., 1.]], jnp.float32)
    ky = jnp.array([[1., 2., 1.], [0., 0., 0.], [-1., -2., -1.]], jnp.float32)
    wx, wy = kx[None, None], ky[None, None]
    dn = jax.lax.conv_dimension_numbers(x.shape, wx.shape, ("NCHW", "OIHW", "NCHW"))
    sx = jax.lax.conv_general_dilated(x, wx, (1, 1), ((1, 1), (1, 1)),
                                      dimension_numbers=dn)
    sy = jax.lax.conv_general_dilated(x, wy, (1, 1), ((1, 1), (1, 1)),
                                      dimension_numbers=dn)
    return jnp.abs(sx) + jnp.abs(sy)


if __name__ == "__main__":
    key = jax.random.PRNGKey(0)
    k1, k2 = jax.random.split(key)

    # Small shape consistent with the module (single channel).
    N, C, H, W = 2, 1, 16, 16
    x = jax.random.normal(k1, (N, C, H, W), dtype=jnp.float32)
    ref = _sobelxy_ref(x)

    # Default path: full image per grid step, single input stream, no halos.
    out = jax.block_until_ready(sobelxy(x))
    assert out.shape == (N, C, H, W)
    assert out.dtype == jnp.float32
    assert jnp.allclose(out, ref, atol=1e-5, rtol=1e-5)

    # Forced H-tiled path (exercises the 8-row-aligned halo exchange).
    out_tiled = jax.block_until_ready(sobelxy(x, tile_h=8))
    assert jnp.allclose(out_tiled, ref, atol=1e-5, rtol=1e-5)

    # N == 1 auto path: H is split so both v7x TensorCores get a grid step.
    x1 = jax.random.normal(k2, (1, 1, 32, 128), dtype=jnp.float32)
    out1 = jax.block_until_ready(sobelxy(x1))
    assert jnp.allclose(out1, _sobelxy_ref(x1), atol=1e-5, rtol=1e-5)

    print("KERNEL_OK")
</pallas_src>

<mosaic_0001>
module attributes {stable_mosaic.version = 11 : i64} {
  func.func @_sobelxy_full_kernel(%arg0: i32, %arg1: memref<1x1x16x16xf32, #tpu.memory_space<vmem>>, %arg2: memref<1x1x16x16xf32, #tpu.memory_space<vmem>>) attributes {dimension_semantics = [#tpu.dimension_semantics<parallel>], iteration_bounds = array<i64: 2>, scalar_prefetch = 0 : i64, scratch_operands = 0 : i64, tpu.core_type = #tpu.core_type<tc>, window_params = [{transform_indices = @transform_0, window_bounds = array<i64: 1, 1, 16, 16>}, {transform_indices = @transform_1, window_bounds = array<i64: 1, 1, 16, 16>}]} {
    %c0 = arith.constant 0 : index
    %c0_0 = arith.constant 0 : index
    %c0_1 = arith.constant 0 : index
    %c0_2 = arith.constant 0 : index
    %0 = vector.load %arg1[%c0, %c0_0, %c0_1, %c0_2] : memref<1x1x16x16xf32, #tpu.memory_space<vmem>>, vector<1x1x16x16xf32>
    %1 = vector.shape_cast %0 : vector<1x1x16x16xf32> to vector<16x16xf32>
    %2 = tpu.iota {dimensions = array<i32: 0>} : vector<16x16xi32>
    %c0_i32 = arith.constant 0 : i32
    %3 = vector.broadcast %c0_i32 : i32 to vector<16x16xi32>
    %4 = arith.cmpi eq, %2, %3 : vector<16x16xi32>
    %c1_i32 = arith.constant 1 : i32
    %5 = tpu.dynamic_rotate %1 by %c1_i32 dim 0 : vector<16x16xf32>, i32 -> vector<16x16xf32>
    %cst = arith.constant 0.000000e+00 : f32
    %6 = vector.broadcast %cst : f32 to vector<16x16xf32>
    %7 = arith.select %4, %6, %5 : vector<16x16xi1>, vector<16x16xf32>
    %c15_i32 = arith.constant 15 : i32
    %8 = vector.broadcast %c15_i32 : i32 to vector<16x16xi32>
    %9 = arith.cmpi eq, %2, %8 : vector<16x16xi32>
    %c15_i32_3 = arith.constant 15 : i32
    %10 = tpu.dynamic_rotate %1 by %c15_i32_3 dim 0 : vector<16x16xf32>, i32 -> vector<16x16xf32>
    %cst_4 = arith.constant 0.000000e+00 : f32
    %11 = vector.broadcast %cst_4 : f32 to vector<16x16xf32>
    %12 = arith.select %9, %11, %10 : vector<16x16xi1>, vector<16x16xf32>
    %cst_5 = arith.constant 2.000000e+00 : f32
    %13 = vector.broadcast %cst_5 : f32 to vector<16x16xf32>
    %14 = arith.mulf %13, %1 : vector<16x16xf32>
    %15 = arith.addf %7, %14 : vector<16x16xf32>
    %16 = arith.addf %15, %12 : vector<16x16xf32>
    %17 = arith.subf %7, %12 : vector<16x16xf32>
    %18 = tpu.iota {dimensions = array<i32: 1>} : vector<16x16xi32>
    %c0_i32_6 = arith.constant 0 : i32
    %19 = vector.broadcast %c0_i32_6 : i32 to vector<16x16xi32>
    %20 = arith.cmpi eq, %18, %19 : vector<16x16xi32>
    %c15_i32_7 = arith.constant 15 : i32
    %21 = vector.broadcast %c15_i32_7 : i32 to vector<16x16xi32>
    %22 = arith.cmpi eq, %18, %21 : vector<16x16xi32>
    %c1_i32_8 = arith.constant 1 : i32
    %23 = tpu.dynamic_rotate %16 by %c1_i32_8 dim 1 : vector<16x16xf32>, i32 -> vector<16x16xf32>
    %cst_9 = arith.constant 0.000000e+00 : f32
    %24 = vector.broadcast %cst_9 : f32 to vector<16x16xf32>
    %25 = arith.select %20, %24, %23 : vector<16x16xi1>, vector<16x16xf32>
    %c15_i32_10 = arith.constant 15 : i32
    %26 = tpu.dynamic_rotate %16 by %c15_i32_10 dim 1 : vector<16x16xf32>, i32 -> vector<16x16xf32>
    %cst_11 = arith.constant 0.000000e+00 : f32
    %27 = vector.broadcast %cst_11 : f32 to vector<16x16xf32>
    %28 = arith.select %22, %27, %26 : vector<16x16xi1>, vector<16x16xf32>
    %c1_i32_12 = arith.constant 1 : i32
    %29 = tpu.dynamic_rotate %17 by %c1_i32_12 dim 1 : vector<16x16xf32>, i32 -> vector<16x16xf32>
    %cst_13 = arith.constant 0.000000e+00 : f32
    %30 = vector.broadcast %cst_13 : f32 to vector<16x16xf32>
    %31 = arith.select %20, %30, %29 : vector<16x16xi1>, vector<16x16xf32>
    %c15_i32_14 = arith.constant 15 : i32
    %32 = tpu.dynamic_rotate %17 by %c15_i32_14 dim 1 : vector<16x16xf32>, i32 -> vector<16x16xf32>
    %cst_15 = arith.constant 0.000000e+00 : f32
    %33 = vector.broadcast %cst_15 : f32 to vector<16x16xf32>
    %34 = arith.select %22, %33, %32 : vector<16x16xi1>, vector<16x16xf32>
    %35 = arith.subf %28, %25 : vector<16x16xf32>
    %36 = math.absf %35 : vector<16x16xf32>
    %cst_16 = arith.constant 2.000000e+00 : f32
    %37 = vector.broadcast %cst_16 : f32 to vector<16x16xf32>
    %38 = arith.mulf %37, %17 : vector<16x16xf32>
    %39 = arith.addf %31, %38 : vector<16x16xf32>
    %40 = arith.addf %39, %34 : vector<16x16xf32>
    %41 = math.absf %40 : vector<16x16xf32>
    %42 = arith.addf %36, %41 : vector<16x16xf32>
    %c0_17 = arith.constant 0 : index
    %c0_18 = arith.constant 0 : index
    %c0_19 = arith.constant 0 : index
    %c0_20 = arith.constant 0 : index
    %43 = vector.load %arg2[%c0_17, %c0_18, %c0_19, %c0_20] : memref<1x1x16x16xf32, #tpu.memory_space<vmem>>, vector<1x1x16x16xf32>
    %44 = vector.shape_cast %43 : vector<1x1x16x16xf32> to vector<16x16xf32>
    %45 = vector.shape_cast %42 : vector<16x16xf32> to vector<1x1x16x16xf32>
    tpu.vector_store %arg2[%c0_17, %c0_18, %c0_19, %c0_20], %45 {strides = array<i32>} : memref<1x1x16x16xf32, #tpu.memory_space<vmem>>, vector<1x1x16x16xf32>,
    return
  }
  func.func @transform_0(%arg0: i32) -> (i32, i32, i32, i32) {
    %c0_i32 = arith.constant 0 : i32
    %c0_i32_0 = arith.constant 0 : i32
    %c0_i32_1 = arith.constant 0 : i32
    %c0_i32_2 = arith.constant 0 : i32
    return %arg0, %c0_i32, %c0_i32_0, %c0_i32_1 : i32, i32, i32, i32
  }
  func.func @transform_1(%arg0: i32) -> (i32, i32, i32, i32) {
    %c0_i32 = arith.constant 0 : i32
    %c0_i32_0 = arith.constant 0 : i32
    %c0_i32_1 = arith.constant 0 : i32
    %c0_i32_2 = arith.constant 0 : i32
    return %arg0, %c0_i32, %c0_i32_0, %c0_i32_1 : i32, i32, i32, i32
  }
}

</mosaic_0001>

<bundles_post_ra>
// kernel: tpu_custom_call.1
= control target key start
LH: loop header
LB: loop body
LE: loop exit
PB: predicated region body
PF: predicated region fallthrough
CT: control target
= control target key end

     0   :  { %6 = vsyncpa [#allocation3], 0  ;;  %s705_s0 = inlined_call_operand.hbm [shape: f32[2,1,16,16], index: 0, kind: input, shape index: {}]   ;;  %s706_s1 = inlined_call_operand.hbm [shape: f32[2,1,16,16], index: 1, kind: output, shape index: {}]  }
   0x1   :  { %8 = vsyncpa [#allocation3 + $0x1], 0 }
   0x2   :  { %9 = vsyncpa [#allocation4], 0 }
   0x3   :  { %11 = vsyncpa [#allocation4 + $0x1], 0  ;;  %s521_s6 = smov 0   ;;  %s523_s7 = smov 0  }
   0x4   :  { %s525_s8 = smov 0   ;;  %s527_s9 = smov 0  }
   0x5 LB: > { %s542_s10 = sadd.s32 4294967295, %s500_s9   ;;  %s335_s11 = sadd.s32 4294967294, %s500_s9   ;;  %s500_s9 = sphi %s527_s9, %s719_s9   ;;  %s496_s8 = sphi %s525_s8, %s718_s8   ;;  %s492_s7 = sphi %s523_s7, %s717_s7   ;;  %s488_s6 = sphi %s521_s6, %s716_s6  }
   0x6   : > { %s546_s12 = sadd.s32 1, %s500_s9   ;;  %s24_s13 = sadd.s32 1, %s496_s8 }
   0x7   : > { %s21_s14 = ssub.s32 %s500_s9, %s546_s12  ;;  %p31_p0 = scmp.ne.s32.totalorder %s496_s8, %s492_s7 }
   0x8   : > { %p22_p1 = scmp.eq.s32.totalorder %s21_s14, 0  ;;  %p32_p2 = scmp.eq.s32.totalorder %s500_s9, 0 }
   0x9   : > { %p37_p3 = scmp.ne.s32.totalorder %s492_s7, %s488_s6  ;;  %p38_p4 = scmp.eq.s32.totalorder %s542_s10, 0 }
   0xa   : > { %s558_s15 = scalar_select %p22_p1, %s496_s8, %s24_s13  }
   0xb   : > { %p560_p5 = por %p32_p2, %p31_p0  ;;  %p564_p6 = por %p38_p4, %p37_p3 }
   0xc   : > { %p61_p7 = scmp.eq.s32.totalorder %s542_s10, 1  ;;  %p67_p8 = scmp.eq.s32.totalorder %s335_s11, 1 }
   0xd   : > { %p363_p10 = scmp.lt.s32.totalorder %s500_s9, 2  ;;  %s87_s20 = sand.u32 1, %s496_s8  }
   0xe   : > { %p571_p11 = por %p61_p7, %p31_p0  ;;  %p575_p12 = por %p67_p8, %p37_p3 }
   0xf   : > { %s349_s21 = sshll.u32 %s500_s9, 8  ;;  %s338_s22 = sshll.u32 %s87_s20, 4 }
  0x10   : > { %s710_s18 = scalar_select %p571_p11, 1, 0 }
  0x11   : > { %s711_s19 = scalar_select %p575_p12, 1, 0 }
  0x12   : > { %s584_s25 = scalar_lea.hbm %s705_s0, %s349_s21  ;;  %s91_s26 = scalar_lea.vmem [#allocation2], %s338_s22 }
  0x13   : > { %s98_s27 = sshll.u32 %s91_s26, 4  ;;  %p588_p13 = pnand %p363_p10, %p560_p5  ;;  %s592_s27 = int_to_ptr.vmem [resolvable:$true] %s98_s27 }
  0x14   : > { %s594_s29 = scalar_lea.sflag [#allocation3], %s87_s20  ;;  %s404_s30 = scalar_lea.hbm %s584_s25, 256 }
  0x15   : > { %p405_p0 = scmp.ne.s32.totalorder %s584_s25, %s404_s30  ;;  %p406_p1 = pneg %p588_p13 }
  0x16   : > { %s409_s4 = scalar_lea.hbm %s705_s0, 512  ;;  %p410_p4 = scmp.lt.u32.totalorder %s584_s25, %s705_s0 }
  0x17   : > { %p407_p2 = pnand %p406_p1, %p405_p0  ;;  %p411_p5 = scmp.lt.u32.totalorder %s409_s4, %s404_s30 }
  0x18   : > { %p413_p8 = scmp.lt.u32.totalorder %s404_s30, %s584_s25 }
  0x19   : > { %p408_p3 = pneg %p407_p2  ;;  %p412_p7 = por %p411_p5, %p410_p4 }
  0x1b   : > { %p414_p10 = por %p413_p8, %p412_p7 }
  0x1d   : > { %p415_p9 = pnand %p414_p10, %p408_p3 }
  0x1f   : > { %418 = shalt.err (!%p415_p9)
}
  0x20   : > { %s419_s13 = scalar_lea.vmem %s592_s27, 256  ;;  %s502_s14 = smov [#allocation2]  }
  0x21   : > { %p420_p0 = scmp.ne.s32.totalorder %s592_s27, %s419_s13  ;;  %s424_s16 = sshll.u32 %s502_s14, 4  ;;  %s425_s16 = int_to_ptr.vmem [resolvable:$false] %s424_s16 }
  0x22   : > { %s426_s20 = scalar_lea.vmem %s425_s16, 512  ;;  %p427_p11 = scmp.lt.s32.totalorder %s592_s27, %s425_s16 }
  0x23   : > { %p422_p2 = pnand %p420_p0, %p406_p1  ;;  %p428_p4 = scmp.lt.s32.totalorder %s426_s20, %s419_s13 }
  0x25   : > { %p423_p12 = pneg %p422_p2  ;;  %p429_p5 = por %p428_p4, %p427_p11 }
  0x27   : > { %p430_p7 = pnand %p429_p5, %p423_p12 }
  0x29   : > { %433 = shalt.err (!%p430_p7)
}
  0x2a   : > { %s503_s21 = smov 128   ;;  %s504_s22 = smov 8  }
  0x2b   : > { %358 = dma.hbm_to_vmem [thread:$0]  (!%p588_p13), %s584_s25, 256, %s592_s27, %s594_s29, %s503_s21, %s503_s21, %s504_s22  }
  0x2c   : > { %p341_p9 = scmp.ge.s32.totalorder %s500_s9, 1  ;;  %p106_p1 = scmp.lt.s32.totalorder %s500_s9, 3 }
  0x2e   : > { %p107_p3 = pnand %p341_p9, %p106_p1 }
  0x2f   : > { %s625_s23 = sand.u32 (!%p107_p3), 1, %s492_s7  }
  0x30   : > { %110 = sbr.rel (%p107_p3) target bundleno = 450 (0x1c2), region = 24  ;;  %s342_s24 = sshll.u32 (!%p107_p3), %s625_s23, 4 }
  0x31   : > { %s113_s26 = scalar_lea.sflag (!%p107_p3), [#allocation3], %s625_s23  ;;  %s116_s30 = scalar_lea.vmem (!%p107_p3), [#allocation2], %s342_s24 }
  0x37   : > { %479 = dma.done.wait (%p564_p6), %s113_s26, 256  }
  0x38   : > { %481 = vsyncadd (%p564_p6), %s113_s26, 4294967040  ;;  %v137_v0 = vlaneseq  ;;  %v135_v3 = vld [vmem:[%s116_s30] sm:$0xff]  ;;  %v136_v4 = vld [vmem:[%s116_s30 + $0x8] sm:$0xff]  ;;  %s505_s17 = smov 16   ;;  %vm170_vm4 = vcmask 1047680   ;;  %s506_s25 = smov 113  }
  0x39   : > { %v142_v5 = vrot.slane %v135_v3, 7  ;;  %v143_v6 = vrot.slane %v136_v4, 7  ;;  %v151_v7 = vrot.slane %v135_v3, 1  ;;  %v152_v8 = vrot.slane %v136_v4, 1  ;;  %s507_s27 = smov 127   ;;  %s350_s28 = sshll.u32 %s542_s10, 8 }
  0x3a   : > { %v138_v1 = vshrl.u32 %v137_v0, 7  ;;  %v158_v9 = vmul.f32 2.0, %v135_v3  ;;  %v159_v10 = vmul.f32 2.0, %v136_v4  ;;  %v167_v40 = vand.u32 127, %v137_v0  ;;  %s134_s29 = scalar_lea.vmem [#allocation5], %s342_s24  ;;  %s659_s5 = scalar_lea.hbm %s706_s1, %s350_s28 }
  0x3b   : > { %vm245_vm7 = vcmask 130048   ;;  %s262_s2 = sshll.u32 %s134_s29, 4  ;;  %s249_s11 = scalar_lea.sflag [#allocation4], %s625_s23  ;;  %s661_s2 = int_to_ptr.vmem [resolvable:$true] %s262_s2 }
  0x3c   : > { %v139_v2 = vadd.s32 8, %v138_v1  ;;  %vm140_vm0 = vcmp.eq.s32.totalorder %v138_v1, 0  ;;  %vm144_vm1 = vcmp.lt.s32.totalorder %v138_v1, 1  ;;  %vm153_vm2 = vcmp.lt.s32.totalorder %v138_v1, 7  ;;  %s434_s10 = scalar_lea.vmem %s661_s2, 256  ;;  %p713_p11 = scmp.ne.s32.totalorder %s710_s18, 0 }
  0x3d   : > { %v146_v11 = vsel %vm144_vm1, %v143_v6, %v142_v5  ;;  %v154_v12 = vsel %vm153_vm2, %v151_v7, %v152_v8  ;;  %v155_v13 = vsel %vm153_vm2, %v152_v8, %v151_v7  ;;  %v145_v15 = vsel %vm144_vm1, %v142_v5, %v143_v6  ;;  %p435_p6 = scmp.ne.s32.totalorder %s661_s2, %s434_s10  ;;  %s508_s13 = smov [#allocation5]  }
  0x3e   : > { %vm150_vm3 = vcmp.eq.s32.totalorder %v139_v2, 15  ;;  %v147_v14 = vsel %vm140_vm0, 0.0, %v146_v11  ;;  %v161_v19 = vadd.f32 %v159_v10, %v145_v15  ;;  %vm168_vm5 = vcmp.eq.s32.totalorder %v167_v40, 0  ;;  %s438_s14 = sshll.u32 %s508_s13, 4  ;;  %s439_s14 = int_to_ptr.vmem [resolvable:$false] %s438_s14 }
  0x3f   : > { %v157_v16 = vsel %vm150_vm3, 0.0, %v155_v13  ;;  %v164_v17 = vsub.f32 %v147_v14, %v154_v12  ;;  %v160_v18 = vadd.f32 %v158_v9, %v147_v14  ;;  %vm169_vm6 = vcmp.eq.s32.totalorder %v167_v40, 15  ;;  %p436_p12 = pnand %p435_p6, %p713_p11  ;;  %s440_s16 = scalar_lea.vmem %s439_s14, 512 }
  0x40   : > { %v165_v21 = vsub.f32 %v145_v15, %v157_v16  ;;  %v163_v22 = vadd.f32 %v161_v19, %v157_v16  ;;  %p441_p8 = scmp.lt.s32.totalorder %s661_s2, %s439_s14  ;;  %p442_p10 = scmp.lt.s32.totalorder %s440_s16, %s434_s10 }
  0x41   : > { %201 = vrot.lane.b32.xlu0 %v164_v17, %s505_s17  ;;  %v162_v20 = vadd.f32 %v160_v18, %v154_v12  ;;  %v235_v43 = vmul.f32 2.0, %v164_v17  ;;  %p437_p13 = pneg %p436_p12 }
  0x42   : > { %v236_v50 = vmul.f32 2.0, %v165_v21  ;;  %p443_p0 = por %p442_p10, %p441_p8 }
  0x43   : > { %171 = vrot.lane.b32.xlu1 %v162_v20, %s505_s17 }
  0x44   : > { %p444_p2 = pnand %p443_p0, %p437_p13 }
  0x45   : > { %204 = vrot.lane.b32.xlu0 %v165_v21, %s505_s17 }
  0x47   : > { %174 = vrot.lane.b32.xlu1 %v163_v22, %s505_s17 }
  0xb3   : > { %v202_v23 = vpop.permute.xlu0 %201 }
  0xb4   : > { %v203_v24 = vsel %vm170_vm4, %v202_v23, %v164_v17 }
  0xb5   : > { %207 = vrot.lane.b32.xlu0 %v203_v24, %s505_s17  ;;  %v172_v25 = vpop.permute.xlu1 %171 }
  0xb6   : > { %v173_v26 = vsel %vm170_vm4, %v172_v25, %v162_v20 }
  0xb7   : > { %v205_v27 = vpop.permute.xlu0 %204 }
  0xb8   : > { %v206_v28 = vsel %vm170_vm4, %v205_v27, %v165_v21 }
  0xb9   : > { %177 = vrot.lane.b32.xlu0 %v173_v26, %s505_s17  ;;  %209 = vrot.lane.b32.xlu1 %v206_v28, %s505_s17  ;;  %v175_v29 = vpop.permute.xlu1 %174 }
  0xba   : > { %v176_v30 = vsel %vm170_vm4, %v175_v29, %v163_v22 }
  0xbd   : > { %179 = vrot.lane.b32.xlu1 %v176_v30, %s505_s17 }
 0x127   : > { %v208_v31 = vpop.permute.xlu0 %207 }
 0x128   : > { %v211_v32 = vsel %vm170_vm4, %v208_v31, %v164_v17 }
 0x129   : > { %215 = vrot.lane.b32.xlu0 %v211_v32, %s506_s25 }
 0x12b   : > { %v178_v33 = vpop.permute.xlu0 %177  ;;  %v210_v34 = vpop.permute.xlu1 %209 }
 0x12c   : > { %v181_v35 = vsel %vm170_vm4, %v178_v33, %v162_v20  ;;  %v212_v36 = vsel %vm170_vm4, %v210_v34, %v165_v21 }
 0x12d   : > { %185 = vrot.lane.b32.xlu0 %v181_v35, %s506_s25  ;;  %217 = vrot.lane.b32.xlu1 %v212_v36, %s506_s25 }
 0x12f   : > { %v180_v37 = vpop.permute.xlu1 %179 }
 0x130   : > { %v182_v38 = vsel %vm170_vm4, %v180_v37, %v163_v22 }
 0x131   : > { %193 = vrot.lane.b32.xlu0 %v181_v35, %s507_s27  ;;  %187 = vrot.lane.b32.xlu1 %v182_v38, %s506_s25 }
 0x135   : > { %223 = vrot.lane.b32.xlu0 %v211_v32, %s507_s27  ;;  %195 = vrot.lane.b32.xlu1 %v182_v38, %s507_s27 }
 0x139   : > { %225 = vrot.lane.b32.xlu1 %v212_v36, %s507_s27 }
 0x19b   : > { %v216_v39 = vpop.permute.xlu0 %215 }
 0x19c   : > { %v221_v46 = vsel %vm168_vm5, 0.0, %v216_v39 }
 0x19d   : > { %v237_v49 = vadd.f32 %v235_v43, %v221_v46 }
 0x19f   : > { %v186_v41 = vpop.permute.xlu0 %185  ;;  %v218_v42 = vpop.permute.xlu1 %217 }
 0x1a0   : > { %v191_v48 = vsel %vm168_vm5, 0.0, %v186_v41  ;;  %v222_v54 = vsel %vm168_vm5, 0.0, %v218_v42 }
 0x1a1   : > { %v238_v59 = vadd.f32 %v236_v50, %v222_v54 }
 0x1a3   : > { %v194_v44 = vpop.permute.xlu0 %193  ;;  %v188_v45 = vpop.permute.xlu1 %187 }
 0x1a4   : > { %v199_v47 = vsel %vm169_vm6, 0.0, %v194_v44  ;;  %v192_v58 = vsel %vm168_vm5, 0.0, %v188_v45 }
 0x1a5   : > { %v231_v51 = vsub.f32 %v199_v47, %v191_v48 }
 0x1a7   : > { %v224_v52 = vpop.permute.xlu0 %223  ;;  %v196_v53 = vpop.permute.xlu1 %195  ;;  %v233_v60 = vand.u32 2147483647, %v231_v51 }
 0x1a8   : > { %v229_v55 = vsel %vm169_vm6, 0.0, %v224_v52  ;;  %v200_v56 = vsel %vm169_vm6, 0.0, %v196_v53 }
 0x1a9   : > { %v239_v57 = vadd.f32 %v237_v49, %v229_v55  ;;  %v232_v62 = vsub.f32 %v200_v56, %v192_v58 }
 0x1ab   : > { %v241_v61 = vand.u32 2147483647, %v239_v57  ;;  %v226_v63 = vpop.permute.xlu1 %225  ;;  %v234_v3 = vand.u32 2147483647, %v232_v62 }
 0x1ac   : > { %v230_v0 = vsel %vm169_vm6, 0.0, %v226_v63 }
 0x1ad   : > { %v243_v1 = vadd.f32 %v241_v61, %v233_v60  ;;  %v240_v2 = vadd.f32 %v238_v59, %v230_v0 }
 0x1af   : > { %246 = vst.msk [vmem:[%s134_s29] sm:$0xff] %vm245_vm7, %v243_v1  ;;  %v242_v4 = vand.u32 2147483647, %v240_v2 }
 0x1b1   : > { %v244_v5 = vadd.f32 %v242_v4, %v234_v3 }
 0x1b3   : > { %247 = vst.msk [vmem:[%s134_s29 + $0x8] sm:$0xff] %vm245_vm7, %v244_v5 }
 0x1b4   : > { %447 = shalt.err (!%p444_p2)
}
 0x1b5   : > { %s448_s20 = scalar_lea.hbm %s659_s5, 256  ;;  %s452_s24 = scalar_lea.hbm %s706_s1, 512 }
 0x1b6   : > { %p449_p4 = scmp.ne.s32.totalorder %s659_s5, %s448_s20  ;;  %p453_p9 = scmp.lt.u32.totalorder %s659_s5, %s706_s1 }
 0x1b7   : > { %p454_p1 = scmp.lt.u32.totalorder %s452_s24, %s448_s20  ;;  %p456_p6 = scmp.lt.u32.totalorder %s448_s20, %s659_s5 }
 0x1b8   : > { %p450_p5 = pnand %p449_p4, %p713_p11 }
 0x1b9   : > { %p455_p3 = por %p454_p1, %p453_p9 }
 0x1ba   : > { %p451_p7 = pneg %p450_p5 }
 0x1bb   : > { %p457_p12 = por %p456_p6, %p455_p3 }
 0x1bd   : > { %p458_p13 = pnand %p457_p12, %p451_p7 }
 0x1bf   : > { %461 = shalt.err (!%p458_p13)
}
 0x1c0   : > { %s509_s17 = smov 128   ;;  %s510_s25 = smov 8  }
 0x1c1   : > { %353 = dma.vmem_to_hbm [thread:$0]  (%p713_p11), %s661_s2, 256, %s659_s5, %s249_s11, %s509_s17, %s509_s17, %s510_s25  }
 0x1c2 PF: > { %s277_s27 = sand.u32 1, %s488_s6   ;;  %p714_p8 = scmp.ne.s32.totalorder %s711_s19, 0 }
 0x1c3   : > { %p715_p10 = scmp.ge.s32.totalorder %s500_s9, 2  ;;  %s278_s28 = scalar_lea.sflag [#allocation4], %s277_s27 }
 0x1c5   : > { %p360_p0 = pnand %p715_p10, %p714_p8 }
 0x1c7   : > { %483 = dma.done.wait (!%p360_p0), %s278_s28, 256  }
 0x1c8   : > { %485 = vsyncadd (!%p360_p0), %s278_s28, 4294967040  ;;  %p14_p2 = scmp.ge.s32.totalorder %s546_s12, 4   ;;  %s716_s6 = smov %s492_s7 }
 0x1c9   : > { %s717_s7 = smov %s496_s8  ;;  %s718_s8 = smov %s558_s15 }
 0x1ca   : > { %s719_s9 = smov %s546_s12  ;;  %16 = sbr.rel (!%p14_p2) target bundleno = 5 (0x5), region = 69 }
 0x1d1   :  { %283 = vsyncpa [#allocation3], 1 }
 0x1d2   :  { %285 = vsyncpa [#allocation3 + $0x1], 1 }
 0x1d3   :  { %286 = vsyncpa [#allocation4], 1 }
 0x1d4   :  { %288 = vsyncpa [#allocation4 + $0x1], 1 }

</bundles_post_ra>
